<compile_context>
chip_gen: v6e
topology: v6e:2x2x1
jax: 0.10.0
libtpu: 0.0.40
codegen_flags: <defaults>
</compile_context>

<pallas_src>
import math

import jax
import jax.numpy as jnp
from jax.experimental import pallas as pl
from jax.experimental.pallas import tpu as pltpu


def _round_up(v, m):
    return ((v + m - 1) // m) * m


def _make_gcn_kernel(tile, x_resident):
    """Build the (row-tile i, reduce-tile k) kernel for ((adj + I) @ x) @ W + b."""

    def kernel(adj_ref, x_ref, w_ref, b_ref, out_ref, acc_ref):
        i = pl.program_id(0)              # output row tile
        k = pl.program_id(1)              # reduction tile (columns of adj / rows of x)

        @pl.when(k == 0)
        def _init():
            acc_ref[...] = jnp.zeros_like(acc_ref)

        if x_resident:
            # x is fully VMEM-resident: slice the reduce tile in-kernel.
            x_k = x_ref[pl.ds(pl.multiple_of(k * tile, tile), tile), :]
        else:
            # x streamed one reduce tile per step by the BlockSpec.
            x_k = x_ref[...]

        # Neighborhood aggregation on the MXU (compute dtype x compute dtype,
        # f32 accumulation) -- no in-kernel upcast of adj.
        acc_ref[...] += jnp.dot(adj_ref[...], x_k,
                                preferred_element_type=jnp.float32)

        # Self-loop contribution: (adj + I) @ x == adj @ x + x.  The row-tile
        # and reduce-tile sizes are both `tile` (single constant), so at k == i
        # the current x tile holds exactly the rows of this output tile.
        @pl.when(k == i)
        def _self_loop():
            acc_ref[...] += x_k.astype(jnp.float32)

        # Finalize: projection + bias + store only on the last reduce step.
        @pl.when(k == pl.num_programs(1) - 1)
        def _finalize():
            out_ref[...] = (
                jnp.dot(acc_ref[...].astype(w_ref.dtype), w_ref[...],
                        preferred_element_type=jnp.float32)
                + b_ref[...]
            ).astype(out_ref.dtype)

    return kernel


def gcn_forward(x, adj, weight, bias=None, *, tile=512,
                compute_dtype=jnp.bfloat16,
                x_resident_budget_bytes=16 * 1024 * 1024):
    """GCN forward.  x:(N,F_in), adj:(N,N), weight:(F_in,F_out), bias:(F_out,)|None.

    compute_dtype=bf16 is exact for 0/1 adjacencies (as used by the reference
    module); use jnp.float32 if adj carries fractional (normalized) weights.
    """
    n, f_in = x.shape
    assert adj.shape == (n, n)
    f_out = weight.shape[1]
    if bias is None:
        bias = jnp.zeros((f_out,), jnp.float32)

    # Small-graph guard: never pad N beyond the next multiple of 128.
    tile = max(128, min(tile, _round_up(n, 128)))

    n_pad = _round_up(n, tile)
    f_in_pad = _round_up(f_in, 128)
    f_out_pad = _round_up(f_out, 128)
    itemsize = jnp.dtype(compute_dtype).itemsize

    # Wrapper-side padding is layout plumbing only; zero padding does not
    # change the math and padded rows/cols are sliced off on return.
    x_p = jnp.pad(x.astype(jnp.float32),
                  ((0, n_pad - n), (0, f_in_pad - f_in))).astype(compute_dtype)
    adj_p = jnp.pad(adj, ((0, n_pad - n), (0, n_pad - n))).astype(compute_dtype)
    w_p = jnp.pad(weight.astype(jnp.float32),
                  ((0, f_in_pad - f_in), (0, f_out_pad - f_out))).astype(compute_dtype)
    b_p = jnp.pad(bias.reshape(1, f_out).astype(jnp.float32),
                  ((0, 0), (0, f_out_pad - f_out)))

    m_tiles = n_pad // tile
    k_tiles = n_pad // tile

    # x: keep the whole matrix VMEM-resident if it fits the budget (no
    # re-streaming per row tile); otherwise stream one reduce tile per step.
    x_resident = n_pad * f_in_pad * itemsize <= x_resident_budget_bytes
    if x_resident:
        x_spec = pl.BlockSpec((n_pad, f_in_pad), lambda i, k: (0, 0))
        x_hbm_bytes = n_pad * f_in_pad * itemsize
        x_vmem_bytes = n_pad * f_in_pad * itemsize
    else:
        # TODO(synk): for very large graphs x is streamed once per row tile;
        # a manual two-level pipeline could remove that residual traffic.
        x_spec = pl.BlockSpec((tile, f_in_pad), lambda i, k: (k, 0))
        x_hbm_bytes = m_tiles * n_pad * f_in_pad * itemsize
        x_vmem_bytes = 2 * tile * f_in_pad * itemsize

    # VMEM limit derived from the actual footprint (+50% headroom, 64 MiB cap
    # so it also fits v7x's physical VMEM).
    vmem_bytes = (
        2 * tile * tile * itemsize              # adj, double-buffered
        + x_vmem_bytes                          # x (resident or streamed)
        + 2 * f_in_pad * f_out_pad * itemsize   # W
        + 2 * f_out_pad * 4                     # bias
        + tile * f_in_pad * 4                   # f32 accumulator scratch
        + 2 * tile * f_out_pad * 4              # output tile, double-buffered
    )
    vmem_limit = int(min(max(vmem_bytes * 3 // 2 + (2 << 20), 16 << 20), 64 << 20))

    cost = pl.CostEstimate(
        flops=2 * n_pad * n_pad * f_in_pad + 2 * n_pad * f_in_pad * f_out_pad,
        transcendentals=0,
        bytes_accessed=(n_pad * n_pad * itemsize          # adj
                        + x_hbm_bytes                     # x
                        + f_in_pad * f_out_pad * itemsize # W
                        + 4 * f_out_pad                   # bias
                        + 4 * n_pad * f_out_pad),         # out (f32)
    )

    out_p = pl.pallas_call(
        _make_gcn_kernel(tile, x_resident),
        out_shape=jax.ShapeDtypeStruct((n_pad, f_out_pad), jnp.float32),
        grid_spec=pltpu.PrefetchScalarGridSpec(
            num_scalar_prefetch=0,
            grid=(m_tiles, k_tiles),                                  # reduce axis last
            in_specs=[
                pl.BlockSpec((tile, tile), lambda i, k: (i, k)),      # adj tile
                x_spec,                                               # x (resident/stream)
                pl.BlockSpec((f_in_pad, f_out_pad), lambda i, k: (0, 0)),  # W resident
                pl.BlockSpec((1, f_out_pad), lambda i, k: (0, 0)),    # bias resident
            ],
            out_specs=pl.BlockSpec((tile, f_out_pad), lambda i, k: (i, 0)),
            scratch_shapes=[pltpu.VMEM((tile, f_in_pad), jnp.float32)],  # accumulator
        ),
        compiler_params=pltpu.CompilerParams(
            dimension_semantics=("parallel", "arbitrary"),
            vmem_limit_bytes=vmem_limit,
        ),
        cost_estimate=cost,
    )(adj_p, x_p, w_p, b_p)

    return out_p[:n, :f_out]


def init_params(key, in_features, out_features):
    """Deterministic xavier_uniform_ weight + zero bias (matches reset_parameters)."""
    bound = math.sqrt(6.0 / (in_features + out_features))
    weight = jax.random.uniform(
        key, (in_features, out_features), jnp.float32, minval=-bound, maxval=bound)
    bias = jnp.zeros((out_features,), jnp.float32)
    return weight, bias


if __name__ == "__main__":
    key = jax.random.PRNGKey(0)
    k_x, k_adj, k_w = jax.random.split(key, 3)

    N = 8            # number of graph nodes
    F_IN = 32        # in_features
    F_OUT = 16       # out_features

    x = jax.random.normal(k_x, (N, F_IN), jnp.float32)
    # Symmetric 0/1 adjacency (no self loops; kernel adds them like the module).
    rand = jax.random.uniform(k_adj, (N, N))
    adj = (rand + rand.T > 1.0).astype(jnp.float32)
    adj = adj * (1.0 - jnp.eye(N, dtype=jnp.float32))

    weight, bias = init_params(k_w, F_IN, F_OUT)

    # Pure-JAX reference of the module's forward math.
    ref = ((adj + jnp.eye(N)) @ x) @ weight + bias

    # f32 path: matches the reference to f32 matmul accuracy.
    out_f32 = jax.block_until_ready(
        gcn_forward(x, adj, weight, bias, compute_dtype=jnp.float32))
    assert out_f32.shape == (N, F_OUT)
    assert jnp.allclose(out_f32, ref, atol=1e-4, rtol=1e-4)

    # Default bf16 MXU path (0/1 adjacency exact in bf16; features rounded).
    out_bf16 = jax.block_until_ready(gcn_forward(x, adj, weight, bias))
    assert out_bf16.shape == (N, F_OUT)
    assert jnp.allclose(out_bf16, ref, atol=5e-2, rtol=5e-2)

    print("KERNEL_OK")
</pallas_src>

<mosaic_0001>
module attributes {stable_mosaic.version = 11 : i64} {
  func.func @kernel(%arg0: i32, %arg1: i32, %arg2: memref<128x128xf32, #tpu.memory_space<vmem>>, %arg3: memref<128x128xf32, #tpu.memory_space<vmem>>, %arg4: memref<128x128xf32, #tpu.memory_space<vmem>>, %arg5: memref<1x128xf32, #tpu.memory_space<vmem>>, %arg6: memref<128x128xf32, #tpu.memory_space<vmem>>, %arg7: memref<128x128xf32, #tpu.memory_space<vmem>>) attributes {dimension_semantics = [#tpu.dimension_semantics<parallel>, #tpu.dimension_semantics<arbitrary>], iteration_bounds = array<i64: 1, 1>, scalar_prefetch = 0 : i64, scratch_operands = 1 : i64, tpu.core_type = #tpu.core_type<tc>, window_params = [{transform_indices = @transform_0, window_bounds = array<i64: 128, 128>}, {pipeline_mode = #tpu.pipeline_mode<synchronous>, transform_indices = @transform_1, window_bounds = array<i64: 128, 128>}, {pipeline_mode = #tpu.pipeline_mode<synchronous>, transform_indices = @transform_2, window_bounds = array<i64: 128, 128>}, {pipeline_mode = #tpu.pipeline_mode<synchronous>, transform_indices = @transform_3, window_bounds = array<i64: 1, 128>}, {transform_indices = @transform_4, window_bounds = array<i64: 128, 128>}]} {
    %c0_i32 = arith.constant 0 : i32
    %0 = arith.cmpi eq, %arg1, %c0_i32 : i32
    %1 = arith.extui %0 : i1 to i32
    %c0_i32_0 = arith.constant 0 : i32
    %2 = arith.cmpi ne, %1, %c0_i32_0 : i32
    scf.if %2 {
      %cst_10 = arith.constant 0.000000e+00 : f32
      %18 = vector.broadcast %cst_10 : f32 to vector<128x128xf32>
      %c0_11 = arith.constant 0 : index
      %c0_12 = arith.constant 0 : index
      %19 = vector.load %arg7[%c0_11, %c0_12] : memref<128x128xf32, #tpu.memory_space<vmem>>, vector<128x128xf32>
      tpu.vector_store %arg7[%c0_11, %c0_12], %18 {strides = array<i32>} : memref<128x128xf32, #tpu.memory_space<vmem>>, vector<128x128xf32>,
    } else {
    }
    %c128_i32 = arith.constant 128 : i32
    %3 = arith.muli %arg1, %c128_i32 : i32
    %4 = tpu.assume_multiple %3, 128 : i32
    %5 = arith.index_cast %4 : i32 to index
    %c0 = arith.constant 0 : index
    %6 = vector.load %arg3[%5, %c0] : memref<128x128xf32, #tpu.memory_space<vmem>>, vector<128x128xf32>
    %c0_1 = arith.constant 0 : index
    %c0_2 = arith.constant 0 : index
    %7 = vector.load %arg7[%c0_1, %c0_2] : memref<128x128xf32, #tpu.memory_space<vmem>>, vector<128x128xf32>
    %c0_3 = arith.constant 0 : index
    %c0_4 = arith.constant 0 : index
    %8 = vector.load %arg2[%c0_3, %c0_4] : memref<128x128xf32, #tpu.memory_space<vmem>>, vector<128x128xf32>
    %cst = arith.constant dense<0.000000e+00> : vector<128x128xf32>
    %9 = tpu.matmul %8, %6, %cst {dimension_numbers = #tpu.dot_dimension_numbers<[1], [0], [0], [1], [0, 0, 1, 1], [], []>} : vector<128x128xf32>, vector<128x128xf32>, vector<128x128xf32> -> vector<128x128xf32>
    %10 = arith.addf %7, %9 : vector<128x128xf32>
    %c0_5 = arith.constant 0 : index
    %c0_6 = arith.constant 0 : index
    %11 = vector.load %arg7[%c0_5, %c0_6] : memref<128x128xf32, #tpu.memory_space<vmem>>, vector<128x128xf32>
    tpu.vector_store %arg7[%c0_5, %c0_6], %10 {strides = array<i32>} : memref<128x128xf32, #tpu.memory_space<vmem>>, vector<128x128xf32>,
    %12 = arith.cmpi eq, %arg1, %arg0 : i32
    %13 = arith.extui %12 : i1 to i32
    %c0_i32_7 = arith.constant 0 : i32
    %14 = arith.cmpi ne, %13, %c0_i32_7 : i32
    scf.if %14 {
      %c0_10 = arith.constant 0 : index
      %c0_11 = arith.constant 0 : index
      %18 = vector.load %arg7[%c0_10, %c0_11] : memref<128x128xf32, #tpu.memory_space<vmem>>, vector<128x128xf32>
      %19 = arith.addf %18, %6 : vector<128x128xf32>
      %c0_12 = arith.constant 0 : index
      %c0_13 = arith.constant 0 : index
      %20 = vector.load %arg7[%c0_12, %c0_13] : memref<128x128xf32, #tpu.memory_space<vmem>>, vector<128x128xf32>
      tpu.vector_store %arg7[%c0_12, %c0_13], %19 {strides = array<i32>} : memref<128x128xf32, #tpu.memory_space<vmem>>, vector<128x128xf32>,
    } else {
    }
    %c0_i32_8 = arith.constant 0 : i32
    %15 = arith.cmpi eq, %arg1, %c0_i32_8 : i32
    %16 = arith.extui %15 : i1 to i32
    %c0_i32_9 = arith.constant 0 : i32
    %17 = arith.cmpi ne, %16, %c0_i32_9 : i32
    scf.if %17 {
      %c0_10 = arith.constant 0 : index
      %c0_11 = arith.constant 0 : index
      %18 = vector.load %arg7[%c0_10, %c0_11] : memref<128x128xf32, #tpu.memory_space<vmem>>, vector<128x128xf32>
      %c0_12 = arith.constant 0 : index
      %c0_13 = arith.constant 0 : index
      %19 = vector.load %arg4[%c0_12, %c0_13] : memref<128x128xf32, #tpu.memory_space<vmem>>, vector<128x128xf32>
      %cst_14 = arith.constant dense<0.000000e+00> : vector<128x128xf32>
      %20 = tpu.matmul %18, %19, %cst_14 {dimension_numbers = #tpu.dot_dimension_numbers<[1], [0], [0], [1], [0, 0, 1, 1], [], []>} : vector<128x128xf32>, vector<128x128xf32>, vector<128x128xf32> -> vector<128x128xf32>
      %c0_15 = arith.constant 0 : index
      %c0_16 = arith.constant 0 : index
      %21 = vector.load %arg5[%c0_15, %c0_16] : memref<1x128xf32, #tpu.memory_space<vmem>>, vector<1x128xf32>
      %22 = vector.broadcast %21 : vector<1x128xf32> to vector<128x128xf32>
      %23 = arith.addf %20, %22 : vector<128x128xf32>
      %c0_17 = arith.constant 0 : index
      %c0_18 = arith.constant 0 : index
      %24 = vector.load %arg6[%c0_17, %c0_18] : memref<128x128xf32, #tpu.memory_space<vmem>>, vector<128x128xf32>
      tpu.vector_store %arg6[%c0_17, %c0_18], %23 {strides = array<i32>} : memref<128x128xf32, #tpu.memory_space<vmem>>, vector<128x128xf32>,
    } else {
    }
    return
  }
  func.func @transform_0(%arg0: i32, %arg1: i32) -> (i32, i32) {
    %c0_i32 = arith.constant 0 : i32
    return %arg0, %arg1 : i32, i32
  }
  func.func @transform_1(%arg0: i32, %arg1: i32) -> (i32, i32) {
    %c0_i32 = arith.constant 0 : i32
    %c0_i32_0 = arith.constant 0 : i32
    %c0_i32_1 = arith.constant 0 : i32
    return %c0_i32, %c0_i32_0 : i32, i32
  }
  func.func @transform_2(%arg0: i32, %arg1: i32) -> (i32, i32) {
    %c0_i32 = arith.constant 0 : i32
    %c0_i32_0 = arith.constant 0 : i32
    %c0_i32_1 = arith.constant 0 : i32
    return %c0_i32, %c0_i32_0 : i32, i32
  }
  func.func @transform_3(%arg0: i32, %arg1: i32) -> (i32, i32) {
    %c0_i32 = arith.constant 0 : i32
    %c0_i32_0 = arith.constant 0 : i32
    %c0_i32_1 = arith.constant 0 : i32
    return %c0_i32, %c0_i32_0 : i32, i32
  }
  func.func @transform_4(%arg0: i32, %arg1: i32) -> (i32, i32) {
    %c0_i32 = arith.constant 0 : i32
    %c0_i32_0 = arith.constant 0 : i32
    return %arg0, %c0_i32 : i32, i32
  }
}

</mosaic_0001>

<bundles_post_ra>
// kernel: tpu_custom_call.1
= control target key start
LH: loop header
LB: loop body
LE: loop exit
PB: predicated region body
PF: predicated region fallthrough
CT: control target
= control target key end

     0   :  { %9 = vsyncpa [#allocation4], 0  ;;  %s981_s0 = inlined_call_operand.hbm [shape: f32[128,128], index: 0, kind: input, shape index: {}]   ;;  %s982_s1 = inlined_call_operand.hbm [shape: f32[128,128], index: 1, kind: input, shape index: {}]   ;;  %s983_s2 = inlined_call_operand.hbm [shape: f32[128,128], index: 2, kind: input, shape index: {}]   ;;  %s984_s3 = inlined_call_operand.vmem [shape: f32[1,128], index: 3, kind: input, shape index: {}]   ;;  %s985_s4 = inlined_call_operand.hbm [shape: f32[128,128], index: 4, kind: output, shape index: {}]  }
   0x1   :  { %10 = vsyncpa [#allocation7], 0 }
   0x2   :  { %11 = vsyncpa [#allocation5], 0  ;;  %s848_s15 = smov [#allocation6]   ;;  %s849_s17 = smov [#allocation3]  }
   0x3   :  { %s29_s16 = sshll.u32 %s848_s15, 4  ;;  %s17_s18 = sshll.u32 %s849_s17, 4  ;;  %s30_s16 = int_to_ptr.vmem [resolvable:$true] %s29_s16  ;;  %s18_s18 = int_to_ptr.vmem [resolvable:$true] %s17_s18 }
   0x4   :  { %s770_s19 = scalar_lea.vmem %s30_s16, 2048  ;;  %p775_p1 = scmp.lt.s32.totalorder %s30_s16, %s30_s16 }
   0x5   :  { %p771_p0 = scmp.ne.s32.totalorder %s30_s16, %s770_s19  ;;  %p776_p2 = scmp.lt.s32.totalorder %s770_s19, %s770_s19 }
   0x7   :  { %p777_p3 = por %p776_p2, %p775_p1 }
   0x9   :  { %p778_p4 = pnand %p777_p3, %p771_p0 }
   0xb   :  { %781 = shalt.err (!%p778_p4)
}
   0xc   :  { %s850_s20 = smov 128   ;;  %s851_s21 = smov 8  }
   0xd   :  { %35 = dma.hbm_to_vmem [thread:$0]  %s982_s1, 2048, %s30_s16, [#allocation7], %s850_s20, %s850_s20, %s851_s21  }
   0xe   :  { %s790_s24 = scalar_lea.vmem %s18_s18, 2048  ;;  %p795_p6 = scmp.lt.s32.totalorder %s18_s18, %s18_s18 }
   0xf   :  { %p791_p5 = scmp.ne.s32.totalorder %s18_s18, %s790_s24  ;;  %p796_p7 = scmp.lt.s32.totalorder %s790_s24, %s790_s24 }
  0x11   :  { %p797_p8 = por %p796_p7, %p795_p6 }
  0x13   :  { %p798_p9 = pnand %p797_p8, %p791_p5 }
  0x15   :  { %801 = shalt.err (!%p798_p9)
}
  0x16   :  { %23 = dma.hbm_to_vmem [thread:$0]  %s981_s0, 2048, %s18_s18, [#allocation4], %s850_s20, %s850_s20, %s851_s21  }
  0x17   :  { %s852_s27 = smov [#allocation8]  }
  0x18   :  { %s41_s28 = sshll.u32 %s852_s27, 4  ;;  %s42_s28 = int_to_ptr.vmem [resolvable:$true] %s41_s28 }
  0x19   :  { %s810_s29 = scalar_lea.vmem %s42_s28, 2048  ;;  %p815_p11 = scmp.lt.s32.totalorder %s42_s28, %s42_s28 }
  0x1a   :  { %p811_p10 = scmp.ne.s32.totalorder %s42_s28, %s810_s29  ;;  %p816_p12 = scmp.lt.s32.totalorder %s810_s29, %s810_s29 }
  0x1c   :  { %p817_p13 = por %p816_p12, %p815_p11 }
  0x1e   :  { %p818_p0 = pnand %p817_p13, %p811_p10 }
  0x20   :  { %821 = shalt.err (!%p818_p0)
}
  0x21   :  { %47 = dma.hbm_to_vmem [thread:$0]  %s983_s2, 2048, %s42_s28, [#allocation7], %s850_s20, %s850_s20, %s851_s21  }
  0x22   :  { %842 = dma.done.wait [#allocation4], 2048  }
  0x23   :  { %843 = vsyncadd [#allocation4], 4294965248 }
  0x24   :  { %844 = dma.done.wait [#allocation7], 4096  }
  0x25   :  { %845 = vsyncadd [#allocation7], 4294963200  ;;  %v897_v0 = vld [vmem:[#allocation6 + $0x78] sm:$0xff]  ;;  %v899_v1 = vld [vmem:[#allocation6 + $0x70] sm:$0xff] }
  0x26   :  { %644 = vmatprep.subr.mxu0 %v897_v0  ;;  %v903_v2 = vld [vmem:[#allocation6 + $0x68] sm:$0xff]  ;;  %v907_v3 = vld [vmem:[#allocation6 + $0x60] sm:$0xff]  ;;  %v911_v5 = vld [vmem:[#allocation6 + $0x58] sm:$0xff] }
  0x27   :  { %645 = vmatpush3.msra.mxu0 %v897_v0  ;;  %v113_v4 = vld [vmem:[#allocation3] sm:$0xff]  ;;  %v915_v6 = vld [vmem:[#allocation6 + $0x50] sm:$0xff]  ;;  %v919_v7 = vld [vmem:[#allocation6 + $0x48] sm:$0xff] }
  0x28   :  { %646 = vmatprep.subr.mxu0 %v899_v1  ;;  %676 = vmatprep.mubr.f32.mxu0 %v113_v4  ;;  %v392_v8 = vld [vmem:[#allocation8 + $0x78] sm:$0xff]  ;;  %v391_v9 = vld [vmem:[#allocation8 + $0x70] sm:$0xff]  ;;  %v923_v10 = vld [vmem:[#allocation6 + $0x40] sm:$0xff] }
  0x29   :  { %647 = vmatpush3.msra.mxu0 %v899_v1  ;;  %700 = vmatprep.subr.mxu1 %v392_v8  ;;  %v390_v11 = vld [vmem:[#allocation8 + $0x68] sm:$0xff]  ;;  %v927_v12 = vld [vmem:[#allocation6 + $0x38] sm:$0xff]  ;;  %v389_v13 = vld [vmem:[#allocation8 + $0x60] sm:$0xff] }
  0x2a   :  { %648 = vmatprep.subr.mxu0 %v903_v2  ;;  %701 = vmatpush3.msra.mxu1 %v392_v8  ;;  %v931_v14 = vld [vmem:[#allocation6 + $0x30] sm:$0xff]  ;;  %v388_v15 = vld [vmem:[#allocation8 + $0x58] sm:$0xff]  ;;  %v935_v16 = vld [vmem:[#allocation6 + $0x28] sm:$0xff] }
  0x2b   :  { %649 = vmatpush3.msra.mxu0 %v903_v2  ;;  %702 = vmatprep.subr.mxu1 %v391_v9  ;;  %v387_v17 = vld [vmem:[#allocation8 + $0x50] sm:$0xff]  ;;  %v939_v18 = vld [vmem:[#allocation6 + $0x20] sm:$0xff]  ;;  %v386_v19 = vld [vmem:[#allocation8 + $0x48] sm:$0xff] }
  0x2c   :  { %650 = vmatprep.subr.mxu0 %v907_v3  ;;  %703 = vmatpush3.msra.mxu1 %v391_v9  ;;  %v943_v20 = vld [vmem:[#allocation6 + $0x18] sm:$0xff]  ;;  %v385_v21 = vld [vmem:[#allocation8 + $0x40] sm:$0xff]  ;;  %v947_v22 = vld [vmem:[#allocation6 + $0x10] sm:$0xff] }
  0x2d   :  { %651 = vmatpush3.msra.mxu0 %v907_v3  ;;  %704 = vmatprep.subr.mxu1 %v390_v11  ;;  %v384_v23 = vld [vmem:[#allocation8 + $0x38] sm:$0xff]  ;;  %v951_v24 = vld [vmem:[#allocation6 + $0x8] sm:$0xff]  ;;  %v383_v25 = vld [vmem:[#allocation8 + $0x30] sm:$0xff] }
  0x2e   :  { %652 = vmatprep.subr.mxu0 %v911_v5  ;;  %705 = vmatpush3.msra.mxu1 %v390_v11  ;;  %v81_v26 = vld [vmem:[#allocation6] sm:$0xff]  ;;  %v382_v27 = vld [vmem:[#allocation8 + $0x28] sm:$0xff]  ;;  %v115_v30 = vld [vmem:[#allocation3 + $0x10] sm:$0xff] }
  0x2f   :  { %653 = vmatpush3.msra.mxu0 %v911_v5  ;;  %706 = vmatprep.subr.mxu1 %v389_v13  ;;  %v114_v28 = vld [vmem:[#allocation3 + $0x8] sm:$0xff]  ;;  %v381_v29 = vld [vmem:[#allocation8 + $0x20] sm:$0xff]  ;;  %v380_v31 = vld [vmem:[#allocation8 + $0x18] sm:$0xff] }
  0x30   :  { %654 = vmatprep.subr.mxu0 %v915_v6  ;;  %707 = vmatpush3.msra.mxu1 %v389_v13  ;;  %v116_v32 = vld [vmem:[#allocation3 + $0x18] sm:$0xff]  ;;  %v117_v33 = vld [vmem:[#allocation3 + $0x20] sm:$0xff]  ;;  %v118_v34 = vld [vmem:[#allocation3 + $0x28] sm:$0xff] }
  0x31   :  { %655 = vmatpush3.msra.mxu0 %v915_v6  ;;  %708 = vmatprep.subr.mxu1 %v388_v15  ;;  %v119_v35 = vld [vmem:[#allocation3 + $0x30] sm:$0xff]  ;;  %v120_v36 = vld [vmem:[#allocation3 + $0x38] sm:$0xff]  ;;  %v121_v37 = vld [vmem:[#allocation3 + $0x40] sm:$0xff] }
  0x32   :  { %656 = vmatprep.subr.mxu0 %v919_v7  ;;  %709 = vmatpush3.msra.mxu1 %v388_v15  ;;  %v122_v38 = vld [vmem:[#allocation3 + $0x48] sm:$0xff]  ;;  %v123_v39 = vld [vmem:[#allocation3 + $0x50] sm:$0xff]  ;;  %v124_v40 = vld [vmem:[#allocation3 + $0x58] sm:$0xff] }
  0x33   :  { %657 = vmatpush3.msra.mxu0 %v919_v7  ;;  %710 = vmatprep.subr.mxu1 %v387_v17  ;;  %v125_v41 = vld [vmem:[#allocation3 + $0x60] sm:$0xff]  ;;  %v126_v42 = vld [vmem:[#allocation3 + $0x68] sm:$0xff]  ;;  %v127_v43 = vld [vmem:[#allocation3 + $0x70] sm:$0xff] }
  0x34   :  { %658 = vmatprep.subr.mxu0 %v923_v10  ;;  %711 = vmatpush3.msra.mxu1 %v387_v17  ;;  %v128_v44 = vld [vmem:[#allocation3 + $0x78] sm:$0xff]  ;;  %v379_v45 = vld [vmem:[#allocation8 + $0x10] sm:$0xff]  ;;  %v378_v46 = vld [vmem:[#allocation8 + $0x8] sm:$0xff] }
  0x35   :  { %659 = vmatpush3.msra.mxu0 %v923_v10  ;;  %712 = vmatprep.subr.mxu1 %v386_v19  ;;  %v377_v47 = vld [vmem:[#allocation8] sm:$0xff] }
  0x36   :  { %660 = vmatprep.subr.mxu0 %v927_v12  ;;  %713 = vmatpush3.msra.mxu1 %v386_v19 }
  0x37   :  { %661 = vmatpush3.msra.mxu0 %v927_v12  ;;  %714 = vmatprep.subr.mxu1 %v385_v21 }
  0x38   :  { %662 = vmatprep.subr.mxu0 %v931_v14  ;;  %715 = vmatpush3.msra.mxu1 %v385_v21 }
  0x39   :  { %663 = vmatpush3.msra.mxu0 %v931_v14  ;;  %716 = vmatprep.subr.mxu1 %v384_v23 }
  0x3a   :  { %664 = vmatprep.subr.mxu0 %v935_v16  ;;  %717 = vmatpush3.msra.mxu1 %v384_v23 }
  0x3b   :  { %665 = vmatpush3.msra.mxu0 %v935_v16  ;;  %718 = vmatprep.subr.mxu1 %v383_v25 }
  0x3c   :  { %666 = vmatprep.subr.mxu0 %v939_v18  ;;  %719 = vmatpush3.msra.mxu1 %v383_v25 }
  0x3d   :  { %667 = vmatpush3.msra.mxu0 %v939_v18  ;;  %720 = vmatprep.subr.mxu1 %v382_v27 }
  0x3e   :  { %668 = vmatprep.subr.mxu0 %v943_v20  ;;  %721 = vmatpush3.msra.mxu1 %v382_v27 }
  0x3f   :  { %669 = vmatpush3.msra.mxu0 %v943_v20  ;;  %722 = vmatprep.subr.mxu1 %v381_v29 }
  0x40   :  { %670 = vmatprep.subr.mxu0 %v947_v22  ;;  %723 = vmatpush3.msra.mxu1 %v381_v29 }
  0x41   :  { %671 = vmatpush3.msra.mxu0 %v947_v22  ;;  %724 = vmatprep.subr.mxu1 %v380_v31 }
  0x42   :  { %672 = vmatprep.subr.mxu0 %v951_v24  ;;  %725 = vmatpush3.msra.mxu1 %v380_v31 }
  0x43   :  { %673 = vmatpush3.msra.mxu0 %v951_v24  ;;  %726 = vmatprep.subr.mxu1 %v379_v45 }
  0x44   :  { %674 = vmatprep.subr.mxu0 %v81_v26  ;;  %727 = vmatpush3.msra.mxu1 %v379_v45 }
  0x45   :  { %675 = vmatpush3.msra.mxu0 %v81_v26  ;;  %728 = vmatprep.subr.mxu1 %v378_v46 }
  0x46   :  { %677 = vmatmul.mubr.f32.vlgmr.msra.gmra.mxu0 %v114_v28  ;;  %729 = vmatpush3.msra.mxu1 %v378_v46 }
  0x47   :  { %679 = vmatprep.mubr.f32.mxu0 %v115_v30  ;;  %730 = vmatprep.subr.mxu1 %v377_v47 }
  0x48   :  { %731 = vmatpush3.msra.mxu1 %v377_v47 }
  0x4a   :  { %680 = vmatmul.mubr.f32.gmra.mxu0 %v116_v32 }
  0x4b   :  { %682 = vmatprep.mubr.f32.mxu0 %v117_v33 }
  0x4e   :  { %683 = vmatmul.mubr.f32.gmra.mxu0 %v118_v34 }
  0x4f   :  { %685 = vmatprep.mubr.f32.mxu0 %v119_v35 }
  0x52   :  { %686 = vmatmul.mubr.f32.gmra.mxu0 %v120_v36 }
  0x53   :  { %688 = vmatprep.mubr.f32.mxu0 %v121_v37 }
  0x56   :  { %689 = vmatmul.mubr.f32.gmra.mxu0 %v122_v38 }
  0x57   :  { %691 = vmatprep.mubr.f32.mxu0 %v123_v39 }
  0x5a   :  { %692 = vmatmul.mubr.f32.gmra.mxu0 %v124_v40 }
  0x5b   :  { %694 = vmatprep.mubr.f32.mxu0 %v125_v41 }
  0x5e   :  { %695 = vmatmul.mubr.f32.gmra.mxu0 %v126_v42 }
  0x5f   :  { %697 = vmatprep.mubr.f32.mxu0 %v127_v43 }
  0x62   :  { %698 = vmatmul.mubr.f32.gmra.mxu0 %v128_v44 }
 0x106   :  { %v678_v48 = vpop.f32.mrf.mxu0 }
 0x107   :  { %v327_v51 = vadd.f32 %v678_v48, %v951_v24 }
 0x108   :  { %v195_v49 = vpop.f32.mrf.mxu0 }
 0x109   :  { %v326_v50 = vadd.f32 %v195_v49, %v81_v26 }
 0x10a   :  { %v681_v52 = vpop.f32.mrf.mxu0 }
 0x10b   :  { %732 = vmatprep.mubr.f32.mxu1 %v326_v50  ;;  %v329_v55 = vadd.f32 %v681_v52, %v943_v20 }
 0x10c   :  { %v205_v53 = vpop.f32.mrf.mxu0  ;;  %733 = vmatmul.mubr.f32.vlgmr.msra.gmra.mxu1 %v327_v51 }
 0x10d   :  { %v328_v54 = vadd.f32 %v205_v53, %v947_v22 }
 0x10e   :  { %v684_v56 = vpop.f32.mrf.mxu0 }
 0x10f   :  { %735 = vmatprep.mubr.f32.mxu1 %v328_v54  ;;  %v331_v59 = vadd.f32 %v684_v56, %v935_v16 }
 0x110   :  { %v215_v57 = vpop.f32.mrf.mxu0  ;;  %736 = vmatmul.mubr.f32.gmra.mxu1 %v329_v55 }
 0x111   :  { %v330_v58 = vadd.f32 %v215_v57, %v939_v18 }
 0x112   :  { %v687_v60 = vpop.f32.mrf.mxu0 }
 0x113   :  { %738 = vmatprep.mubr.f32.mxu1 %v330_v58  ;;  %v333_v63 = vadd.f32 %v687_v60, %v927_v12 }
 0x114   :  { %v225_v61 = vpop.f32.mrf.mxu0  ;;  %739 = vmatmul.mubr.f32.gmra.mxu1 %v331_v59 }
 0x115   :  { %v332_v62 = vadd.f32 %v225_v61, %v931_v14 }
 0x116   :  { %v690_v4 = vpop.f32.mrf.mxu0 }
 0x117   :  { %741 = vmatprep.mubr.f32.mxu1 %v332_v62  ;;  %v335_v11 = vadd.f32 %v690_v4, %v919_v7 }
 0x118   :  { %v235_v8 = vpop.f32.mrf.mxu0  ;;  %742 = vmatmul.mubr.f32.gmra.mxu1 %v333_v63 }
 0x119   :  { %v334_v9 = vadd.f32 %v235_v8, %v923_v10 }
 0x11a   :  { %v693_v13 = vpop.f32.mrf.mxu0 }
 0x11b   :  { %744 = vmatprep.mubr.f32.mxu1 %v334_v9  ;;  %v337_v17 = vadd.f32 %v693_v13, %v911_v5  ;;  %v579_v5 = vld [vmem:[%s984_s3] ss:$0 sm:$0xff]  ;;  %s853_s3 = smov [#allocation9]  }
 0x11c   :  { %v245_v15 = vpop.f32.mrf.mxu0  ;;  %745 = vmatmul.mubr.f32.gmra.mxu1 %v335_v11  ;;  %s566_s5 = sshll.u32 %s853_s3, 4  ;;  %s567_s5 = int_to_ptr.vmem [resolvable:$true] %s566_s5 }
 0x11d   :  { %v336_v16 = vadd.f32 %v245_v15, %v915_v6  ;;  %s822_s6 = scalar_lea.vmem %s567_s5, 2048  ;;  %p827_p2 = scmp.lt.s32.totalorder %s567_s5, %s567_s5 }
 0x11e   :  { %v696_v18 = vpop.f32.mrf.mxu0  ;;  %p823_p1 = scmp.ne.s32.totalorder %s567_s5, %s822_s6  ;;  %p828_p3 = scmp.lt.s32.totalorder %s822_s6, %s822_s6 }
 0x11f   :  { %747 = vmatprep.mubr.f32.mxu1 %v336_v16  ;;  %v339_v19 = vadd.f32 %v696_v18, %v903_v2 }
 0x120   :  { %v255_v14 = vpop.f32.mrf.mxu0  ;;  %748 = vmatmul.mubr.f32.gmra.mxu1 %v337_v17  ;;  %p829_p4 = por %p828_p3, %p827_p2 }
 0x121   :  { %v338_v12 = vadd.f32 %v255_v14, %v907_v3 }
 0x122   :  { %v699_v20 = vpop.f32.mrf.mxu0  ;;  %p830_p5 = pnand %p829_p4, %p823_p1 }
 0x123   :  { %750 = vmatprep.mubr.f32.mxu1 %v338_v12  ;;  %v341_v21 = vadd.f32 %v699_v20, %v897_v0 }
 0x124   :  { %v265_v10 = vpop.f32.mrf.mxu0  ;;  %751 = vmatmul.mubr.f32.gmra.mxu1 %v339_v19 }
 0x125   :  { %v340_v7 = vadd.f32 %v265_v10, %v899_v1 }
 0x127   :  { %753 = vmatprep.mubr.f32.mxu1 %v340_v7 }
 0x128   :  { %754 = vmatmul.mubr.f32.gmra.mxu1 %v341_v21 }
 0x1cc   :  { %v734_v6 = vpop.f32.mrf.mxu1 }
 0x1cd   :  { %v472_v22 = vadd.f32 %v734_v6, %v579_v5 }
 0x1ce   :  { %v466_v23 = vpop.f32.mrf.mxu1 }
 0x1cf   :  { %546 = vst [vmem:[#allocation9 + $0x8] sm:$0xff] %v472_v22  ;;  %v467_v3 = vadd.f32 %v579_v5, %v466_v23 }
 0x1d0   :  { %v737_v2 = vpop.f32.mrf.mxu1 }
 0x1d1   :  { %545 = vst [vmem:[#allocation9] sm:$0xff] %v467_v3  ;;  %v482_v24 = vadd.f32 %v737_v2, %v579_v5 }
 0x1d2   :  { %v476_v25 = vpop.f32.mrf.mxu1 }
 0x1d3   :  { %548 = vst [vmem:[#allocation9 + $0x18] sm:$0xff] %v482_v24  ;;  %v477_v26 = vadd.f32 %v579_v5, %v476_v25 }
 0x1d4   :  { %v740_v1 = vpop.f32.mrf.mxu1 }
 0x1d5   :  { %547 = vst [vmem:[#allocation9 + $0x10] sm:$0xff] %v477_v26  ;;  %v492_v0 = vadd.f32 %v740_v1, %v579_v5 }
 0x1d6   :  { %v486_v27 = vpop.f32.mrf.mxu1 }
 0x1d7   :  { %550 = vst [vmem:[#allocation9 + $0x28] sm:$0xff] %v492_v0  ;;  %v487_v28 = vadd.f32 %v579_v5, %v486_v27 }
 0x1d8   :  { %v743_v29 = vpop.f32.mrf.mxu1 }
 0x1d9   :  { %549 = vst [vmem:[#allocation9 + $0x20] sm:$0xff] %v487_v28  ;;  %v502_v30 = vadd.f32 %v743_v29, %v579_v5 }
 0x1da   :  { %v496_v31 = vpop.f32.mrf.mxu1 }
 0x1db   :  { %552 = vst [vmem:[#allocation9 + $0x38] sm:$0xff] %v502_v30  ;;  %v497_v32 = vadd.f32 %v579_v5, %v496_v31 }
 0x1dc   :  { %v746_v33 = vpop.f32.mrf.mxu1 }
 0x1dd   :  { %551 = vst [vmem:[#allocation9 + $0x30] sm:$0xff] %v497_v32  ;;  %v512_v34 = vadd.f32 %v746_v33, %v579_v5 }
 0x1de   :  { %v506_v35 = vpop.f32.mrf.mxu1 }
 0x1df   :  { %554 = vst [vmem:[#allocation9 + $0x48] sm:$0xff] %v512_v34  ;;  %v507_v36 = vadd.f32 %v579_v5, %v506_v35 }
 0x1e0   :  { %v749_v37 = vpop.f32.mrf.mxu1 }
 0x1e1   :  { %553 = vst [vmem:[#allocation9 + $0x40] sm:$0xff] %v507_v36  ;;  %v522_v38 = vadd.f32 %v749_v37, %v579_v5 }
 0x1e2   :  { %v516_v39 = vpop.f32.mrf.mxu1 }
 0x1e3   :  { %556 = vst [vmem:[#allocation9 + $0x58] sm:$0xff] %v522_v38  ;;  %v517_v40 = vadd.f32 %v579_v5, %v516_v39 }
 0x1e4   :  { %v752_v41 = vpop.f32.mrf.mxu1 }
 0x1e5   :  { %555 = vst [vmem:[#allocation9 + $0x50] sm:$0xff] %v517_v40  ;;  %v532_v42 = vadd.f32 %v752_v41, %v579_v5 }
 0x1e6   :  { %v526_v43 = vpop.f32.mrf.mxu1 }
 0x1e7   :  { %558 = vst [vmem:[#allocation9 + $0x68] sm:$0xff] %v532_v42  ;;  %v527_v44 = vadd.f32 %v579_v5, %v526_v43 }
 0x1e8   :  { %v755_v45 = vpop.f32.mrf.mxu1 }
 0x1e9   :  { %557 = vst [vmem:[#allocation9 + $0x60] sm:$0xff] %v527_v44  ;;  %v542_v46 = vadd.f32 %v755_v45, %v579_v5 }
 0x1ea   :  { %v536_v47 = vpop.f32.mrf.mxu1 }
 0x1eb   :  { %560 = vst [vmem:[#allocation9 + $0x78] sm:$0xff] %v542_v46  ;;  %v537_v48 = vadd.f32 %v579_v5, %v536_v47 }
 0x1ed   :  { %559 = vst [vmem:[#allocation9 + $0x70] sm:$0xff] %v537_v48 }
 0x1ee   :  { %833 = shalt.err (!%p830_p5)
}
 0x1ef   :  { %572 = dma.vmem_to_hbm [thread:$0]  %s567_s5, 2048, %s985_s4, [#allocation5], %s850_s20, %s850_s20, %s851_s21  }
 0x1f0   :  { %846 = dma.done.wait [#allocation5], 2048  }
 0x1f1   :  { %847 = vsyncadd [#allocation5], 4294965248 }
 0x1f2   :  { %576 = vsyncpa [#allocation4], 1 }
 0x1f3   :  { %577 = vsyncpa [#allocation7], 1 }
 0x1f4   :  { %578 = vsyncpa [#allocation5], 1 }

</bundles_post_ra>
